<compile_context>
chip_gen: v5e
topology: v5e:2x2
jax: 0.10.0
libtpu: 0.0.40
codegen_flags: <defaults>
</compile_context>

<pallas_src>
import functools

import jax
import jax.numpy as jnp
from jax import lax
from jax.experimental import pallas as pl
from jax.experimental.pallas import tpu as pltpu

HIDDEN_SIZE = 100
INPUT_SIZE = 64
NUM_CLASSES = 40
NUM_LAYERS = 2      # kernel below is specialized for 2 stacked tanh-RNN layers
LANE = 128          # TPU lane width; H and C are padded up to this

# VMEM byte budget for the double-buffered streamed input-projection block.
_XP_VMEM_BUDGET = 12 * 1024 * 1024


def _round_up(n, m):
    return (n + m - 1) // m * m


def _pad2(a, rows, cols):
    return jnp.pad(a, ((0, rows - a.shape[0]), (0, cols - a.shape[1])))


def _num_tensorcores():
    """Best-effort TensorCores-per-chip (2 on v7x, else 1). Errs toward 1."""
    try:
        kind = jax.devices()[0].device_kind.lower()
    except Exception:
        return 1
    if "v7" in kind or "tpu7" in kind:
        return 2
    return 1


def _batch_block(B, num_tc):
    """Split the batch only on a real 2-TC part, 8-aligned halves, >=32 rows/core."""
    if num_tc >= 2 and B % 16 == 0 and B // 2 >= 32:
        return B // 2
    return B


def _time_chunk(T, bb, Hp, xp_itemsize, cap):
    """Bytes-based chunk along T so the double-buffered xp block fits VMEM."""
    bytes_per_step = 2 * bb * Hp * xp_itemsize      # double-buffered
    tc_cap = max(8, _XP_VMEM_BUDGET // max(bytes_per_step, 1))
    return int(min(T, tc_cap, cap))


def _rnn_kernel(t_total, tc, guard_tail,
                xp_ref,    # (tc, bb, Hp)       hoisted layer-1 input proj (+b1)
                whh1_ref,  # (Hp, Hp)           layer-1 recurrent weight
                wih2_ref,  # (Hp, Hp)           layer-2 input weight
                whh2_ref,  # (Hp, Hp)           layer-2 recurrent weight
                b2_ref,    # (1, Hp) f32        folded layer-2 bias
                wfc_ref,   # (Hp, Cp)           FC head weight
                bfc_ref,   # (1, Cp) f32        FC head bias
                out_ref,   # (bb, Cp) f32
                h1_ref, h2_ref):  # (bb, Hp) f32 VMEM scratch, carried over T
    t_blk = pl.program_id(1)
    cdt = whh1_ref.dtype   # compute dtype for MXU operands (f32 or bf16)

    @pl.when(t_blk == 0)
    def _():
        h1_ref[...] = jnp.zeros_like(h1_ref)
        h2_ref[...] = jnp.zeros_like(h2_ref)

    # Hoist the bias broadcast out of the (unrolled) time loop.
    b2 = jnp.broadcast_to(b2_ref[...], h2_ref.shape)

    def step(s, carry):
        h1, h2 = carry
        # Layer 1: input contribution precomputed; only the recurrence remains
        # on the serial critical path.
        n1 = jnp.tanh(
            xp_ref[s].astype(jnp.float32)
            + jnp.dot(h1.astype(cdt), whh1_ref[...],
                      preferred_element_type=jnp.float32))
        # Layer 2: two K=128 dots against static refs (no per-step lane concat).
        n2 = jnp.tanh(
            jnp.dot(n1.astype(cdt), wih2_ref[...],
                    preferred_element_type=jnp.float32)
            + jnp.dot(h2.astype(cdt), whh2_ref[...],
                      preferred_element_type=jnp.float32)
            + b2)
        if guard_tail:
            # Zero-padded tail steps (T rounded up to a multiple of tc) must
            # not advance the recurrence.
            valid = (t_blk * tc + s) < t_total
            n1 = jnp.where(valid, n1, h1)
            n2 = jnp.where(valid, n2, h2)
        return n1, n2

    h1, h2 = lax.fori_loop(0, tc, step, (h1_ref[...], h2_ref[...]),
                           unroll=min(tc, 16))
    h1_ref[...] = h1
    h2_ref[...] = h2

    # FC head on the top-layer hidden state after the final time step.
    @pl.when(t_blk == pl.num_programs(1) - 1)
    def _():
        out_ref[...] = (
            jnp.dot(h2.astype(wfc_ref.dtype), wfc_ref[...],
                    preferred_element_type=jnp.float32)
            + bfc_ref[...]).astype(out_ref.dtype)


def prepare_params(p, compute_dtype=jnp.float32):
    """One-time fuse/pad of the PyTorch-shaped params for the kernel.

    compute_dtype=jnp.bfloat16 is the v6e/v7x fast path (f32 state and f32
    accumulation are kept); float32 matches the reference tightly.
    """
    H = p["whh1"].shape[0]
    C = p["wfc"].shape[1]
    Hp = _round_up(H, LANE)
    Cp = _round_up(C, LANE)

    wih1 = jnp.pad(p["wih1"], ((0, 0), (0, Hp - H)))           # (I, Hp)  f32
    b1 = _pad2(p["bih1"] + p["bhh1"], 1, Hp)                   # (1, Hp)  f32
    whh1 = _pad2(p["whh1"], Hp, Hp).astype(compute_dtype)      # (Hp, Hp)
    wih2 = _pad2(p["wih2"], Hp, Hp).astype(compute_dtype)      # (Hp, Hp)
    whh2 = _pad2(p["whh2"], Hp, Hp).astype(compute_dtype)      # (Hp, Hp)
    b2 = _pad2(p["bih2"] + p["bhh2"], 1, Hp)                   # (1, Hp)  f32
    wfc = _pad2(p["wfc"], Hp, Cp).astype(compute_dtype)        # (Hp, Cp)
    bfc = _pad2(p["bfc"], 1, Cp)                               # (1, Cp)  f32
    return {"wih1": wih1, "b1": b1, "whh1": whh1, "wih2": wih2, "whh2": whh2,
            "b2": b2, "wfc": wfc, "bfc": bfc}


@functools.partial(jax.jit, static_argnames=("num_classes", "time_chunk_cap"))
def rnn_forward(x, pp, *, num_classes=NUM_CLASSES, time_chunk_cap=512):
    """x: (B, T, I) float32, batch_first like the PyTorch module."""
    B, T, _ = x.shape
    Hp = pp["whh1"].shape[1]
    Cp = pp["wfc"].shape[1]

    # xproj in bf16 on the bf16-weight path (halves HBM traffic / VMEM use);
    # f32 when weights are f32 so the tight numerical check passes.
    xp_dtype = (jnp.bfloat16 if pp["whh1"].dtype == jnp.bfloat16
                else jnp.float32)

    # Hoisted layer-1 input projection for all time steps, time-major.  The
    # (B,T,I) -> (T,B,Hp) transpose is fused into this one dot and the folded
    # layer-1 bias is added here once.
    xproj = (jnp.einsum("bti,ih->tbh", x, pp["wih1"]) + pp["b1"]
             ).astype(xp_dtype)                                # (T, B, Hp)

    num_tc = _num_tensorcores()
    bb = _batch_block(B, num_tc)
    nb = B // bb
    assert B % bb == 0

    xp_itemsize = jnp.dtype(xp_dtype).itemsize
    tc = _time_chunk(T, bb, Hp, xp_itemsize, time_chunk_cap)
    nt = pl.cdiv(T, tc)
    T_pad = nt * tc
    guard_tail = T_pad != T
    if guard_tail:
        # Never keep the whole sequence resident: pad T up to a multiple of tc
        # and mask the padded steps inside the kernel.
        xproj = jnp.pad(xproj, ((0, T_pad - T), (0, 0), (0, 0)))
    assert T_pad % tc == 0

    # Explicit scoped-VMEM limit sized from actual use (double-buffered xp
    # block + resident weights + scratch), clamped under the v7x 64 MiB part.
    w_itemsize = jnp.dtype(pp["whh1"].dtype).itemsize
    need = (2 * tc * bb * Hp * xp_itemsize
            + 2 * (3 * Hp * Hp + Hp * Cp) * w_itemsize
            + 2 * (Hp + Cp) * 4
            + 2 * bb * Cp * 4
            + 2 * bb * Hp * 4)
    vmem_limit = int(min(max(2 * need, 32 << 20), 48 << 20))

    kernel = functools.partial(_rnn_kernel, T, tc, guard_tail)

    out = pl.pallas_call(
        kernel,
        out_shape=jax.ShapeDtypeStruct((B, Cp), jnp.float32),
        grid_spec=pltpu.PrefetchScalarGridSpec(
            num_scalar_prefetch=0,
            grid=(nb, nt),
            in_specs=[
                pl.BlockSpec((tc, bb, Hp), lambda b, t: (t, b, 0)),
                pl.BlockSpec((Hp, Hp), lambda b, t: (0, 0)),
                pl.BlockSpec((Hp, Hp), lambda b, t: (0, 0)),
                pl.BlockSpec((Hp, Hp), lambda b, t: (0, 0)),
                pl.BlockSpec((1, Hp), lambda b, t: (0, 0)),
                pl.BlockSpec((Hp, Cp), lambda b, t: (0, 0)),
                pl.BlockSpec((1, Cp), lambda b, t: (0, 0)),
            ],
            out_specs=pl.BlockSpec((bb, Cp), lambda b, t: (b, 0)),
            scratch_shapes=[pltpu.VMEM((bb, Hp), jnp.float32),
                            pltpu.VMEM((bb, Hp), jnp.float32)]),
        compiler_params=pltpu.CompilerParams(
            dimension_semantics=("parallel", "arbitrary"),
            vmem_limit_bytes=vmem_limit),
    )(xproj, pp["whh1"], pp["wih2"], pp["whh2"], pp["b2"],
      pp["wfc"], pp["bfc"])

    return out[:, :num_classes]


def init_params(key, input_size, hidden_size, num_classes):
    """Deterministic init matching PyTorch parameter shapes (pre-transposed
    to (in, out); biases stored as (1, out) rows)."""
    k = 1.0 / jnp.sqrt(hidden_size)
    keys = jax.random.split(key, 10)

    def u(kk, shape):
        return jax.random.uniform(kk, shape, jnp.float32, -k, k)

    return {
        # layer 0: input -> hidden
        "wih1": u(keys[0], (input_size, hidden_size)),
        "whh1": u(keys[1], (hidden_size, hidden_size)),
        "bih1": u(keys[2], (1, hidden_size)),
        "bhh1": u(keys[3], (1, hidden_size)),
        # layer 1: hidden -> hidden
        "wih2": u(keys[4], (hidden_size, hidden_size)),
        "whh2": u(keys[5], (hidden_size, hidden_size)),
        "bih2": u(keys[6], (1, hidden_size)),
        "bhh2": u(keys[7], (1, hidden_size)),
        # fc head
        "wfc": u(keys[8], (hidden_size, num_classes)),
        "bfc": u(keys[9], (1, num_classes)),
    }


def rnn_reference(x, p):
    """Pure-JAX reference (same math as torch.nn.RNN(tanh, 2 layers) + Linear)."""
    B, T, _ = x.shape
    H = p["whh1"].shape[0]
    h1 = jnp.zeros((B, H), jnp.float32)
    h2 = jnp.zeros((B, H), jnp.float32)
    for t in range(T):
        xt = x[:, t, :]
        h1 = jnp.tanh(xt @ p["wih1"] + p["bih1"] + h1 @ p["whh1"] + p["bhh1"])
        h2 = jnp.tanh(h1 @ p["wih2"] + p["bih2"] + h2 @ p["whh2"] + p["bhh2"])
    return h2 @ p["wfc"] + p["bfc"]


if __name__ == "__main__":
    key = jax.random.PRNGKey(0)
    k_x, k_p = jax.random.split(key)

    batch, seq = 2, 8
    x = jax.random.normal(k_x, (batch, seq, INPUT_SIZE), jnp.float32)
    params = init_params(k_p, INPUT_SIZE, HIDDEN_SIZE, NUM_CLASSES)

    ref = rnn_reference(x, params)

    # f32 path: tight check against the pure-JAX reference.
    pp_f32 = prepare_params(params, compute_dtype=jnp.float32)
    out = jax.block_until_ready(rnn_forward(x, pp_f32))
    assert out.shape == (batch, NUM_CLASSES), out.shape
    assert jnp.allclose(out, ref, atol=1e-4, rtol=1e-4), "f32 mismatch vs reference"

    # Exercise time-chunk streaming + padded-tail guard (T=8, tc=3 -> 1 pad step).
    out_chunked = jax.block_until_ready(rnn_forward(x, pp_f32, time_chunk_cap=3))
    assert jnp.allclose(out_chunked, ref, atol=1e-4, rtol=1e-4), \
        "chunked/padded-tail mismatch vs reference"

    # bf16-weight fast path (v6e/v7x): bf16 weights + bf16 xproj, f32 accumulation.
    pp_bf16 = prepare_params(params, compute_dtype=jnp.bfloat16)
    out_bf16 = jax.block_until_ready(rnn_forward(x, pp_bf16))
    assert out_bf16.shape == (batch, NUM_CLASSES), out_bf16.shape
    assert jnp.allclose(out_bf16, ref, atol=5e-2, rtol=5e-2), "bf16 mismatch vs reference"

    print("KERNEL_OK")
</pallas_src>

<mosaic_0001>
module attributes {stable_mosaic.version = 11 : i64} {
  func.func @_rnn_kernel(%arg0: i32, %arg1: i32, %arg2: memref<8x2x128xf32, #tpu.memory_space<vmem>>, %arg3: memref<128x128xf32, #tpu.memory_space<vmem>>, %arg4: memref<128x128xf32, #tpu.memory_space<vmem>>, %arg5: memref<128x128xf32, #tpu.memory_space<vmem>>, %arg6: memref<1x128xf32, #tpu.memory_space<vmem>>, %arg7: memref<128x128xf32, #tpu.memory_space<vmem>>, %arg8: memref<1x128xf32, #tpu.memory_space<vmem>>, %arg9: memref<2x128xf32, #tpu.memory_space<vmem>>, %arg10: memref<2x128xf32, #tpu.memory_space<vmem>>, %arg11: memref<2x128xf32, #tpu.memory_space<vmem>>) attributes {dimension_semantics = [#tpu.dimension_semantics<parallel>, #tpu.dimension_semantics<arbitrary>], iteration_bounds = array<i64: 1, 1>, scalar_prefetch = 0 : i64, scratch_operands = 2 : i64, tpu.core_type = #tpu.core_type<tc>, window_params = [{transform_indices = @transform_0, window_bounds = array<i64: 8, 2, 128>}, {pipeline_mode = #tpu.pipeline_mode<synchronous>, transform_indices = @transform_1, window_bounds = array<i64: 128, 128>}, {pipeline_mode = #tpu.pipeline_mode<synchronous>, transform_indices = @transform_2, window_bounds = array<i64: 128, 128>}, {pipeline_mode = #tpu.pipeline_mode<synchronous>, transform_indices = @transform_3, window_bounds = array<i64: 128, 128>}, {pipeline_mode = #tpu.pipeline_mode<synchronous>, transform_indices = @transform_4, window_bounds = array<i64: 1, 128>}, {pipeline_mode = #tpu.pipeline_mode<synchronous>, transform_indices = @transform_5, window_bounds = array<i64: 128, 128>}, {pipeline_mode = #tpu.pipeline_mode<synchronous>, transform_indices = @transform_6, window_bounds = array<i64: 1, 128>}, {transform_indices = @transform_7, window_bounds = array<i64: 2, 128>}]} {
    %c0_i32 = arith.constant 0 : i32
    %0 = arith.cmpi eq, %arg1, %c0_i32 : i32
    %1 = arith.extui %0 : i1 to i32
    %c0_i32_0 = arith.constant 0 : i32
    %2 = arith.cmpi ne, %1, %c0_i32_0 : i32
    scf.if %2 {
      %cst_100 = arith.constant 0.000000e+00 : f32
      %125 = vector.broadcast %cst_100 : f32 to vector<2x128xf32>
      %c0_101 = arith.constant 0 : index
      %c0_102 = arith.constant 0 : index
      %126 = vector.load %arg10[%c0_101, %c0_102] : memref<2x128xf32, #tpu.memory_space<vmem>>, vector<2x128xf32>
      tpu.vector_store %arg10[%c0_101, %c0_102], %125 {strides = array<i32>} : memref<2x128xf32, #tpu.memory_space<vmem>>, vector<2x128xf32>,
      %cst_103 = arith.constant 0.000000e+00 : f32
      %127 = vector.broadcast %cst_103 : f32 to vector<2x128xf32>
      %c0_104 = arith.constant 0 : index
      %c0_105 = arith.constant 0 : index
      %128 = vector.load %arg11[%c0_104, %c0_105] : memref<2x128xf32, #tpu.memory_space<vmem>>, vector<2x128xf32>
      tpu.vector_store %arg11[%c0_104, %c0_105], %127 {strides = array<i32>} : memref<2x128xf32, #tpu.memory_space<vmem>>, vector<2x128xf32>,
    } else {
    }
    %c0 = arith.constant 0 : index
    %c0_1 = arith.constant 0 : index
    %3 = vector.load %arg6[%c0, %c0_1] : memref<1x128xf32, #tpu.memory_space<vmem>>, vector<1x128xf32>
    %4 = vector.shape_cast %3 : vector<1x128xf32> to vector<1x128xf32>
    %5 = vector.broadcast %4 : vector<1x128xf32> to vector<2x128xf32>
    %c0_2 = arith.constant 0 : index
    %c0_3 = arith.constant 0 : index
    %6 = vector.load %arg10[%c0_2, %c0_3] : memref<2x128xf32, #tpu.memory_space<vmem>>, vector<2x128xf32>
    %c0_4 = arith.constant 0 : index
    %c0_5 = arith.constant 0 : index
    %7 = vector.load %arg11[%c0_4, %c0_5] : memref<2x128xf32, #tpu.memory_space<vmem>>, vector<2x128xf32>
    %c0_i32_6 = arith.constant 0 : i32
    %8 = arith.index_cast %c0_i32_6 : i32 to index
    %c0_7 = arith.constant 0 : index
    %c0_8 = arith.constant 0 : index
    %9 = vector.load %arg2[%8, %c0_7, %c0_8] : memref<8x2x128xf32, #tpu.memory_space<vmem>>, vector<1x2x128xf32>
    %10 = vector.shape_cast %9 : vector<1x2x128xf32> to vector<2x128xf32>
    %c0_9 = arith.constant 0 : index
    %c0_10 = arith.constant 0 : index
    %11 = vector.load %arg3[%c0_9, %c0_10] : memref<128x128xf32, #tpu.memory_space<vmem>>, vector<128x128xf32>
    %cst = arith.constant dense<0.000000e+00> : vector<2x128xf32>
    %12 = tpu.matmul %6, %11, %cst {dimension_numbers = #tpu.dot_dimension_numbers<[1], [0], [0], [1], [0, 0, 1, 1], [], []>} : vector<2x128xf32>, vector<128x128xf32>, vector<2x128xf32> -> vector<2x128xf32>
    %13 = arith.addf %10, %12 : vector<2x128xf32>
    %14 = math.tanh %13 : vector<2x128xf32>
    %c0_11 = arith.constant 0 : index
    %c0_12 = arith.constant 0 : index
    %15 = vector.load %arg4[%c0_11, %c0_12] : memref<128x128xf32, #tpu.memory_space<vmem>>, vector<128x128xf32>
    %cst_13 = arith.constant dense<0.000000e+00> : vector<2x128xf32>
    %16 = tpu.matmul %14, %15, %cst_13 {dimension_numbers = #tpu.dot_dimension_numbers<[1], [0], [0], [1], [0, 0, 1, 1], [], []>} : vector<2x128xf32>, vector<128x128xf32>, vector<2x128xf32> -> vector<2x128xf32>
    %c0_14 = arith.constant 0 : index
    %c0_15 = arith.constant 0 : index
    %17 = vector.load %arg5[%c0_14, %c0_15] : memref<128x128xf32, #tpu.memory_space<vmem>>, vector<128x128xf32>
    %cst_16 = arith.constant dense<0.000000e+00> : vector<2x128xf32>
    %18 = tpu.matmul %7, %17, %cst_16 {dimension_numbers = #tpu.dot_dimension_numbers<[1], [0], [0], [1], [0, 0, 1, 1], [], []>} : vector<2x128xf32>, vector<128x128xf32>, vector<2x128xf32> -> vector<2x128xf32>
    %19 = arith.addf %16, %18 : vector<2x128xf32>
    %20 = arith.addf %19, %5 : vector<2x128xf32>
    %21 = math.tanh %20 : vector<2x128xf32>
    %c1_i32 = arith.constant 1 : i32
    %22 = arith.index_cast %c1_i32 : i32 to index
    %c0_17 = arith.constant 0 : index
    %c0_18 = arith.constant 0 : index
    %23 = vector.load %arg2[%22, %c0_17, %c0_18] : memref<8x2x128xf32, #tpu.memory_space<vmem>>, vector<1x2x128xf32>
    %24 = vector.shape_cast %23 : vector<1x2x128xf32> to vector<2x128xf32>
    %c0_19 = arith.constant 0 : index
    %c0_20 = arith.constant 0 : index
    %25 = vector.load %arg3[%c0_19, %c0_20] : memref<128x128xf32, #tpu.memory_space<vmem>>, vector<128x128xf32>
    %cst_21 = arith.constant dense<0.000000e+00> : vector<2x128xf32>
    %26 = tpu.matmul %14, %25, %cst_21 {dimension_numbers = #tpu.dot_dimension_numbers<[1], [0], [0], [1], [0, 0, 1, 1], [], []>} : vector<2x128xf32>, vector<128x128xf32>, vector<2x128xf32> -> vector<2x128xf32>
    %27 = arith.addf %24, %26 : vector<2x128xf32>
    %28 = math.tanh %27 : vector<2x128xf32>
    %c0_22 = arith.constant 0 : index
    %c0_23 = arith.constant 0 : index
    %29 = vector.load %arg4[%c0_22, %c0_23] : memref<128x128xf32, #tpu.memory_space<vmem>>, vector<128x128xf32>
    %cst_24 = arith.constant dense<0.000000e+00> : vector<2x128xf32>
    %30 = tpu.matmul %28, %29, %cst_24 {dimension_numbers = #tpu.dot_dimension_numbers<[1], [0], [0], [1], [0, 0, 1, 1], [], []>} : vector<2x128xf32>, vector<128x128xf32>, vector<2x128xf32> -> vector<2x128xf32>
    %c0_25 = arith.constant 0 : index
    %c0_26 = arith.constant 0 : index
    %31 = vector.load %arg5[%c0_25, %c0_26] : memref<128x128xf32, #tpu.memory_space<vmem>>, vector<128x128xf32>
    %cst_27 = arith.constant dense<0.000000e+00> : vector<2x128xf32>
    %32 = tpu.matmul %21, %31, %cst_27 {dimension_numbers = #tpu.dot_dimension_numbers<[1], [0], [0], [1], [0, 0, 1, 1], [], []>} : vector<2x128xf32>, vector<128x128xf32>, vector<2x128xf32> -> vector<2x128xf32>
    %33 = arith.addf %30, %32 : vector<2x128xf32>
    %34 = arith.addf %33, %5 : vector<2x128xf32>
    %35 = math.tanh %34 : vector<2x128xf32>
    %c2_i32 = arith.constant 2 : i32
    %36 = arith.index_cast %c2_i32 : i32 to index
    %c0_28 = arith.constant 0 : index
    %c0_29 = arith.constant 0 : index
    %37 = vector.load %arg2[%36, %c0_28, %c0_29] : memref<8x2x128xf32, #tpu.memory_space<vmem>>, vector<1x2x128xf32>
    %38 = vector.shape_cast %37 : vector<1x2x128xf32> to vector<2x128xf32>
    %c0_30 = arith.constant 0 : index
    %c0_31 = arith.constant 0 : index
    %39 = vector.load %arg3[%c0_30, %c0_31] : memref<128x128xf32, #tpu.memory_space<vmem>>, vector<128x128xf32>
    %cst_32 = arith.constant dense<0.000000e+00> : vector<2x128xf32>
    %40 = tpu.matmul %28, %39, %cst_32 {dimension_numbers = #tpu.dot_dimension_numbers<[1], [0], [0], [1], [0, 0, 1, 1], [], []>} : vector<2x128xf32>, vector<128x128xf32>, vector<2x128xf32> -> vector<2x128xf32>
    %41 = arith.addf %38, %40 : vector<2x128xf32>
    %42 = math.tanh %41 : vector<2x128xf32>
    %c0_33 = arith.constant 0 : index
    %c0_34 = arith.constant 0 : index
    %43 = vector.load %arg4[%c0_33, %c0_34] : memref<128x128xf32, #tpu.memory_space<vmem>>, vector<128x128xf32>
    %cst_35 = arith.constant dense<0.000000e+00> : vector<2x128xf32>
    %44 = tpu.matmul %42, %43, %cst_35 {dimension_numbers = #tpu.dot_dimension_numbers<[1], [0], [0], [1], [0, 0, 1, 1], [], []>} : vector<2x128xf32>, vector<128x128xf32>, vector<2x128xf32> -> vector<2x128xf32>
    %c0_36 = arith.constant 0 : index
    %c0_37 = arith.constant 0 : index
    %45 = vector.load %arg5[%c0_36, %c0_37] : memref<128x128xf32, #tpu.memory_space<vmem>>, vector<128x128xf32>
    %cst_38 = arith.constant dense<0.000000e+00> : vector<2x128xf32>
    %46 = tpu.matmul %35, %45, %cst_38 {dimension_numbers = #tpu.dot_dimension_numbers<[1], [0], [0], [1], [0, 0, 1, 1], [], []>} : vector<2x128xf32>, vector<128x128xf32>, vector<2x128xf32> -> vector<2x128xf32>
    %47 = arith.addf %44, %46 : vector<2x128xf32>
    %48 = arith.addf %47, %5 : vector<2x128xf32>
    %49 = math.tanh %48 : vector<2x128xf32>
    %c3_i32 = arith.constant 3 : i32
    %50 = arith.index_cast %c3_i32 : i32 to index
    %c0_39 = arith.constant 0 : index
    %c0_40 = arith.constant 0 : index
    %51 = vector.load %arg2[%50, %c0_39, %c0_40] : memref<8x2x128xf32, #tpu.memory_space<vmem>>, vector<1x2x128xf32>
    %52 = vector.shape_cast %51 : vector<1x2x128xf32> to vector<2x128xf32>
    %c0_41 = arith.constant 0 : index
    %c0_42 = arith.constant 0 : index
    %53 = vector.load %arg3[%c0_41, %c0_42] : memref<128x128xf32, #tpu.memory_space<vmem>>, vector<128x128xf32>
    %cst_43 = arith.constant dense<0.000000e+00> : vector<2x128xf32>
    %54 = tpu.matmul %42, %53, %cst_43 {dimension_numbers = #tpu.dot_dimension_numbers<[1], [0], [0], [1], [0, 0, 1, 1], [], []>} : vector<2x128xf32>, vector<128x128xf32>, vector<2x128xf32> -> vector<2x128xf32>
    %55 = arith.addf %52, %54 : vector<2x128xf32>
    %56 = math.tanh %55 : vector<2x128xf32>
    %c0_44 = arith.constant 0 : index
    %c0_45 = arith.constant 0 : index
    %57 = vector.load %arg4[%c0_44, %c0_45] : memref<128x128xf32, #tpu.memory_space<vmem>>, vector<128x128xf32>
    %cst_46 = arith.constant dense<0.000000e+00> : vector<2x128xf32>
    %58 = tpu.matmul %56, %57, %cst_46 {dimension_numbers = #tpu.dot_dimension_numbers<[1], [0], [0], [1], [0, 0, 1, 1], [], []>} : vector<2x128xf32>, vector<128x128xf32>, vector<2x128xf32> -> vector<2x128xf32>
    %c0_47 = arith.constant 0 : index
    %c0_48 = arith.constant 0 : index
    %59 = vector.load %arg5[%c0_47, %c0_48] : memref<128x128xf32, #tpu.memory_space<vmem>>, vector<128x128xf32>
    %cst_49 = arith.constant dense<0.000000e+00> : vector<2x128xf32>
    %60 = tpu.matmul %49, %59, %cst_49 {dimension_numbers = #tpu.dot_dimension_numbers<[1], [0], [0], [1], [0, 0, 1, 1], [], []>} : vector<2x128xf32>, vector<128x128xf32>, vector<2x128xf32> -> vector<2x128xf32>
    %61 = arith.addf %58, %60 : vector<2x128xf32>
    %62 = arith.addf %61, %5 : vector<2x128xf32>
    %63 = math.tanh %62 : vector<2x128xf32>
    %c4_i32 = arith.constant 4 : i32
    %64 = arith.index_cast %c4_i32 : i32 to index
    %c0_50 = arith.constant 0 : index
    %c0_51 = arith.constant 0 : index
    %65 = vector.load %arg2[%64, %c0_50, %c0_51] : memref<8x2x128xf32, #tpu.memory_space<vmem>>, vector<1x2x128xf32>
    %66 = vector.shape_cast %65 : vector<1x2x128xf32> to vector<2x128xf32>
    %c0_52 = arith.constant 0 : index
    %c0_53 = arith.constant 0 : index
    %67 = vector.load %arg3[%c0_52, %c0_53] : memref<128x128xf32, #tpu.memory_space<vmem>>, vector<128x128xf32>
    %cst_54 = arith.constant dense<0.000000e+00> : vector<2x128xf32>
    %68 = tpu.matmul %56, %67, %cst_54 {dimension_numbers = #tpu.dot_dimension_numbers<[1], [0], [0], [1], [0, 0, 1, 1], [], []>} : vector<2x128xf32>, vector<128x128xf32>, vector<2x128xf32> -> vector<2x128xf32>
    %69 = arith.addf %66, %68 : vector<2x128xf32>
    %70 = math.tanh %69 : vector<2x128xf32>
    %c0_55 = arith.constant 0 : index
    %c0_56 = arith.constant 0 : index
    %71 = vector.load %arg4[%c0_55, %c0_56] : memref<128x128xf32, #tpu.memory_space<vmem>>, vector<128x128xf32>
    %cst_57 = arith.constant dense<0.000000e+00> : vector<2x128xf32>
    %72 = tpu.matmul %70, %71, %cst_57 {dimension_numbers = #tpu.dot_dimension_numbers<[1], [0], [0], [1], [0, 0, 1, 1], [], []>} : vector<2x128xf32>, vector<128x128xf32>, vector<2x128xf32> -> vector<2x128xf32>
    %c0_58 = arith.constant 0 : index
    %c0_59 = arith.constant 0 : index
    %73 = vector.load %arg5[%c0_58, %c0_59] : memref<128x128xf32, #tpu.memory_space<vmem>>, vector<128x128xf32>
    %cst_60 = arith.constant dense<0.000000e+00> : vector<2x128xf32>
    %74 = tpu.matmul %63, %73, %cst_60 {dimension_numbers = #tpu.dot_dimension_numbers<[1], [0], [0], [1], [0, 0, 1, 1], [], []>} : vector<2x128xf32>, vector<128x128xf32>, vector<2x128xf32> -> vector<2x128xf32>
    %75 = arith.addf %72, %74 : vector<2x128xf32>
    %76 = arith.addf %75, %5 : vector<2x128xf32>
    %77 = math.tanh %76 : vector<2x128xf32>
    %c5_i32 = arith.constant 5 : i32
    %78 = arith.index_cast %c5_i32 : i32 to index
    %c0_61 = arith.constant 0 : index
    %c0_62 = arith.constant 0 : index
    %79 = vector.load %arg2[%78, %c0_61, %c0_62] : memref<8x2x128xf32, #tpu.memory_space<vmem>>, vector<1x2x128xf32>
    %80 = vector.shape_cast %79 : vector<1x2x128xf32> to vector<2x128xf32>
    %c0_63 = arith.constant 0 : index
    %c0_64 = arith.constant 0 : index
    %81 = vector.load %arg3[%c0_63, %c0_64] : memref<128x128xf32, #tpu.memory_space<vmem>>, vector<128x128xf32>
    %cst_65 = arith.constant dense<0.000000e+00> : vector<2x128xf32>
    %82 = tpu.matmul %70, %81, %cst_65 {dimension_numbers = #tpu.dot_dimension_numbers<[1], [0], [0], [1], [0, 0, 1, 1], [], []>} : vector<2x128xf32>, vector<128x128xf32>, vector<2x128xf32> -> vector<2x128xf32>
    %83 = arith.addf %80, %82 : vector<2x128xf32>
    %84 = math.tanh %83 : vector<2x128xf32>
    %c0_66 = arith.constant 0 : index
    %c0_67 = arith.constant 0 : index
    %85 = vector.load %arg4[%c0_66, %c0_67] : memref<128x128xf32, #tpu.memory_space<vmem>>, vector<128x128xf32>
    %cst_68 = arith.constant dense<0.000000e+00> : vector<2x128xf32>
    %86 = tpu.matmul %84, %85, %cst_68 {dimension_numbers = #tpu.dot_dimension_numbers<[1], [0], [0], [1], [0, 0, 1, 1], [], []>} : vector<2x128xf32>, vector<128x128xf32>, vector<2x128xf32> -> vector<2x128xf32>
    %c0_69 = arith.constant 0 : index
    %c0_70 = arith.constant 0 : index
    %87 = vector.load %arg5[%c0_69, %c0_70] : memref<128x128xf32, #tpu.memory_space<vmem>>, vector<128x128xf32>
    %cst_71 = arith.constant dense<0.000000e+00> : vector<2x128xf32>
    %88 = tpu.matmul %77, %87, %cst_71 {dimension_numbers = #tpu.dot_dimension_numbers<[1], [0], [0], [1], [0, 0, 1, 1], [], []>} : vector<2x128xf32>, vector<128x128xf32>, vector<2x128xf32> -> vector<2x128xf32>
    %89 = arith.addf %86, %88 : vector<2x128xf32>
    %90 = arith.addf %89, %5 : vector<2x128xf32>
    %91 = math.tanh %90 : vector<2x128xf32>
    %c6_i32 = arith.constant 6 : i32
    %92 = arith.index_cast %c6_i32 : i32 to index
    %c0_72 = arith.constant 0 : index
    %c0_73 = arith.constant 0 : index
    %93 = vector.load %arg2[%92, %c0_72, %c0_73] : memref<8x2x128xf32, #tpu.memory_space<vmem>>, vector<1x2x128xf32>
    %94 = vector.shape_cast %93 : vector<1x2x128xf32> to vector<2x128xf32>
    %c0_74 = arith.constant 0 : index
    %c0_75 = arith.constant 0 : index
    %95 = vector.load %arg3[%c0_74, %c0_75] : memref<128x128xf32, #tpu.memory_space<vmem>>, vector<128x128xf32>
    %cst_76 = arith.constant dense<0.000000e+00> : vector<2x128xf32>
    %96 = tpu.matmul %84, %95, %cst_76 {dimension_numbers = #tpu.dot_dimension_numbers<[1], [0], [0], [1], [0, 0, 1, 1], [], []>} : vector<2x128xf32>, vector<128x128xf32>, vector<2x128xf32> -> vector<2x128xf32>
    %97 = arith.addf %94, %96 : vector<2x128xf32>
    %98 = math.tanh %97 : vector<2x128xf32>
    %c0_77 = arith.constant 0 : index
    %c0_78 = arith.constant 0 : index
    %99 = vector.load %arg4[%c0_77, %c0_78] : memref<128x128xf32, #tpu.memory_space<vmem>>, vector<128x128xf32>
    %cst_79 = arith.constant dense<0.000000e+00> : vector<2x128xf32>
    %100 = tpu.matmul %98, %99, %cst_79 {dimension_numbers = #tpu.dot_dimension_numbers<[1], [0], [0], [1], [0, 0, 1, 1], [], []>} : vector<2x128xf32>, vector<128x128xf32>, vector<2x128xf32> -> vector<2x128xf32>
    %c0_80 = arith.constant 0 : index
    %c0_81 = arith.constant 0 : index
    %101 = vector.load %arg5[%c0_80, %c0_81] : memref<128x128xf32, #tpu.memory_space<vmem>>, vector<128x128xf32>
    %cst_82 = arith.constant dense<0.000000e+00> : vector<2x128xf32>
    %102 = tpu.matmul %91, %101, %cst_82 {dimension_numbers = #tpu.dot_dimension_numbers<[1], [0], [0], [1], [0, 0, 1, 1], [], []>} : vector<2x128xf32>, vector<128x128xf32>, vector<2x128xf32> -> vector<2x128xf32>
    %103 = arith.addf %100, %102 : vector<2x128xf32>
    %104 = arith.addf %103, %5 : vector<2x128xf32>
    %105 = math.tanh %104 : vector<2x128xf32>
    %c7_i32 = arith.constant 7 : i32
    %106 = arith.index_cast %c7_i32 : i32 to index
    %c0_83 = arith.constant 0 : index
    %c0_84 = arith.constant 0 : index
    %107 = vector.load %arg2[%106, %c0_83, %c0_84] : memref<8x2x128xf32, #tpu.memory_space<vmem>>, vector<1x2x128xf32>
    %108 = vector.shape_cast %107 : vector<1x2x128xf32> to vector<2x128xf32>
    %c0_85 = arith.constant 0 : index
    %c0_86 = arith.constant 0 : index
    %109 = vector.load %arg3[%c0_85, %c0_86] : memref<128x128xf32, #tpu.memory_space<vmem>>, vector<128x128xf32>
    %cst_87 = arith.constant dense<0.000000e+00> : vector<2x128xf32>
    %110 = tpu.matmul %98, %109, %cst_87 {dimension_numbers = #tpu.dot_dimension_numbers<[1], [0], [0], [1], [0, 0, 1, 1], [], []>} : vector<2x128xf32>, vector<128x128xf32>, vector<2x128xf32> -> vector<2x128xf32>
    %111 = arith.addf %108, %110 : vector<2x128xf32>
    %112 = math.tanh %111 : vector<2x128xf32>
    %c0_88 = arith.constant 0 : index
    %c0_89 = arith.constant 0 : index
    %113 = vector.load %arg4[%c0_88, %c0_89] : memref<128x128xf32, #tpu.memory_space<vmem>>, vector<128x128xf32>
    %cst_90 = arith.constant dense<0.000000e+00> : vector<2x128xf32>
    %114 = tpu.matmul %112, %113, %cst_90 {dimension_numbers = #tpu.dot_dimension_numbers<[1], [0], [0], [1], [0, 0, 1, 1], [], []>} : vector<2x128xf32>, vector<128x128xf32>, vector<2x128xf32> -> vector<2x128xf32>
    %c0_91 = arith.constant 0 : index
    %c0_92 = arith.constant 0 : index
    %115 = vector.load %arg5[%c0_91, %c0_92] : memref<128x128xf32, #tpu.memory_space<vmem>>, vector<128x128xf32>
    %cst_93 = arith.constant dense<0.000000e+00> : vector<2x128xf32>
    %116 = tpu.matmul %105, %115, %cst_93 {dimension_numbers = #tpu.dot_dimension_numbers<[1], [0], [0], [1], [0, 0, 1, 1], [], []>} : vector<2x128xf32>, vector<128x128xf32>, vector<2x128xf32> -> vector<2x128xf32>
    %117 = arith.addf %114, %116 : vector<2x128xf32>
    %118 = arith.addf %117, %5 : vector<2x128xf32>
    %119 = math.tanh %118 : vector<2x128xf32>
    %c8_i32 = arith.constant 8 : i32
    %c0_94 = arith.constant 0 : index
    %c0_95 = arith.constant 0 : index
    %120 = vector.load %arg10[%c0_94, %c0_95] : memref<2x128xf32, #tpu.memory_space<vmem>>, vector<2x128xf32>
    tpu.vector_store %arg10[%c0_94, %c0_95], %112 {strides = array<i32>} : memref<2x128xf32, #tpu.memory_space<vmem>>, vector<2x128xf32>,
    %c0_96 = arith.constant 0 : index
    %c0_97 = arith.constant 0 : index
    %121 = vector.load %arg11[%c0_96, %c0_97] : memref<2x128xf32, #tpu.memory_space<vmem>>, vector<2x128xf32>
    tpu.vector_store %arg11[%c0_96, %c0_97], %119 {strides = array<i32>} : memref<2x128xf32, #tpu.memory_space<vmem>>, vector<2x128xf32>,
    %c0_i32_98 = arith.constant 0 : i32
    %122 = arith.cmpi eq, %arg1, %c0_i32_98 : i32
    %123 = arith.extui %122 : i1 to i32
    %c0_i32_99 = arith.constant 0 : i32
    %124 = arith.cmpi ne, %123, %c0_i32_99 : i32
    scf.if %124 {
      %c0_100 = arith.constant 0 : index
      %c0_101 = arith.constant 0 : index
      %125 = vector.load %arg7[%c0_100, %c0_101] : memref<128x128xf32, #tpu.memory_space<vmem>>, vector<128x128xf32>
      %cst_102 = arith.constant dense<0.000000e+00> : vector<2x128xf32>
      %126 = tpu.matmul %119, %125, %cst_102 {dimension_numbers = #tpu.dot_dimension_numbers<[1], [0], [0], [1], [0, 0, 1, 1], [], []>} : vector<2x128xf32>, vector<128x128xf32>, vector<2x128xf32> -> vector<2x128xf32>
      %c0_103 = arith.constant 0 : index
      %c0_104 = arith.constant 0 : index
      %127 = vector.load %arg8[%c0_103, %c0_104] : memref<1x128xf32, #tpu.memory_space<vmem>>, vector<1x128xf32>
      %128 = vector.broadcast %127 : vector<1x128xf32> to vector<2x128xf32>
      %129 = arith.addf %126, %128 : vector<2x128xf32>
      %c0_105 = arith.constant 0 : index
      %c0_106 = arith.constant 0 : index
      %130 = vector.load %arg9[%c0_105, %c0_106] : memref<2x128xf32, #tpu.memory_space<vmem>>, vector<2x128xf32>
      tpu.vector_store %arg9[%c0_105, %c0_106], %129 {strides = array<i32>} : memref<2x128xf32, #tpu.memory_space<vmem>>, vector<2x128xf32>,
    } else {
    }
    return
  }
  func.func @transform_0(%arg0: i32, %arg1: i32) -> (i32, i32, i32) {
    %c0_i32 = arith.constant 0 : i32
    %c0_i32_0 = arith.constant 0 : i32
    return %arg1, %arg0, %c0_i32 : i32, i32, i32
  }
  func.func @transform_1(%arg0: i32, %arg1: i32) -> (i32, i32) {
    %c0_i32 = arith.constant 0 : i32
    %c0_i32_0 = arith.constant 0 : i32
    %c0_i32_1 = arith.constant 0 : i32
    return %c0_i32, %c0_i32_0 : i32, i32
  }
  func.func @transform_2(%arg0: i32, %arg1: i32) -> (i32, i32) {
    %c0_i32 = arith.constant 0 : i32
    %c0_i32_0 = arith.constant 0 : i32
    %c0_i32_1 = arith.constant 0 : i32
    return %c0_i32, %c0_i32_0 : i32, i32
  }
  func.func @transform_3(%arg0: i32, %arg1: i32) -> (i32, i32) {
    %c0_i32 = arith.constant 0 : i32
    %c0_i32_0 = arith.constant 0 : i32
    %c0_i32_1 = arith.constant 0 : i32
    return %c0_i32, %c0_i32_0 : i32, i32
  }
  func.func @transform_4(%arg0: i32, %arg1: i32) -> (i32, i32) {
    %c0_i32 = arith.constant 0 : i32
    %c0_i32_0 = arith.constant 0 : i32
    %c0_i32_1 = arith.constant 0 : i32
    return %c0_i32, %c0_i32_0 : i32, i32
  }
  func.func @transform_5(%arg0: i32, %arg1: i32) -> (i32, i32) {
    %c0_i32 = arith.constant 0 : i32
    %c0_i32_0 = arith.constant 0 : i32
    %c0_i32_1 = arith.constant 0 : i32
    return %c0_i32, %c0_i32_0 : i32, i32
  }
  func.func @transform_6(%arg0: i32, %arg1: i32) -> (i32, i32) {
    %c0_i32 = arith.constant 0 : i32
    %c0_i32_0 = arith.constant 0 : i32
    %c0_i32_1 = arith.constant 0 : i32
    return %c0_i32, %c0_i32_0 : i32, i32
  }
  func.func @transform_7(%arg0: i32, %arg1: i32) -> (i32, i32) {
    %c0_i32 = arith.constant 0 : i32
    %c0_i32_0 = arith.constant 0 : i32
    return %arg0, %c0_i32 : i32, i32
  }
}

</mosaic_0001>

<bundles_post_ra>
// kernel: rnn_forward.1
= control target key start
LH: loop header
LB: loop body
LE: loop exit
PB: predicated region body
PF: predicated region fallthrough
CT: control target
= control target key end

     0   :  { %12 = vsyncpa [#allocation5], 0  ;;  %s1502_s0 = inlined_call_operand.vmem [shape: f32[8,2,128], index: 0, kind: input, shape index: {}]   ;;  %s1503_s1 = inlined_call_operand.vmem [shape: f32[128,128], index: 1, kind: input, shape index: {}]   ;;  %s1504_s2 = inlined_call_operand.hbm [shape: f32[128,128], index: 2, kind: input, shape index: {}]   ;;  %s1505_s3 = inlined_call_operand.hbm [shape: f32[128,128], index: 3, kind: input, shape index: {}]   ;;  %s1506_s4 = inlined_call_operand.vmem [shape: f32[1,128], index: 4, kind: input, shape index: {}]   ;;  %s1507_s5 = inlined_call_operand.hbm [shape: f32[128,128], index: 5, kind: input, shape index: {}]   ;;  %s1508_s6 = inlined_call_operand.vmem [shape: f32[1,128], index: 6, kind: input, shape index: {}]   ;;  %s1509_s7 = inlined_call_operand.hbm [shape: f32[2,128], index: 7, kind: output, shape index: {}]  }
   0x1   :  { %13 = vsyncpa [#allocation8], 0 }
   0x2   :  { %14 = vsyncpa [#allocation6], 0  ;;  %s36_s26 = sshll.u32 %s1505_s3, 4  ;;  %s875_s27 = smov [#allocation7]   ;;  %s37_s26 = int_to_ptr.hbm [resolvable:$true] %s36_s26 }
   0x3   :  { %s38_s28 = sshll.u32 %s875_s27, 4  ;;  %s23_s8 = sshll.u32 %s1504_s2, 4  ;;  %s39_s28 = int_to_ptr.vmem [resolvable:$true] %s38_s28  ;;  %s24_s8 = int_to_ptr.hbm [resolvable:$true] %s23_s8 }
   0x4   :  { %s876_s9 = smov 128   ;;  %s877_s10 = smov 8  }
   0x5   :  { %44 = dma.hbm_to_vmem [thread:$0]  %s37_s26, 2048, %s39_s28, [#allocation8], %s876_s9, %s876_s9, %s877_s10  }
   0x6   :  { %s878_s11 = smov [#allocation4]   ;;  %s51_s15 = sshll.u32 %s1507_s5, 4  ;;  %s52_s15 = int_to_ptr.hbm [resolvable:$true] %s51_s15 }
   0x7   :  { %s25_s12 = sshll.u32 %s878_s11, 4  ;;  %s879_s3 = smov [#allocation9]   ;;  %s26_s12 = int_to_ptr.vmem [resolvable:$true] %s25_s12 }
   0x8   :  { %31 = dma.hbm_to_vmem [thread:$0]  %s24_s8, 2048, %s26_s12, [#allocation5], %s876_s9, %s876_s9, %s877_s10  }
   0x9   :  { %s53_s16 = sshll.u32 %s879_s3, 4  ;;  %s54_s16 = int_to_ptr.vmem [resolvable:$true] %s53_s16 }
   0xa   :  { %59 = dma.hbm_to_vmem [thread:$0]  %s52_s15, 2048, %s54_s16, [#allocation8], %s876_s9, %s876_s9, %s877_s10  }
   0xb   :  { %869 = dma.done.wait [#allocation5], 2048  }
   0xc   :  { %870 = vsyncadd [#allocation5], 4294965248 }
   0xd   :  { %871 = dma.done.wait [#allocation8], 4096  }
   0xe   :  { %872 = vsyncadd [#allocation8], 4294963200  ;;  %v880_v0 = vmov 0.0   ;;  %v934_v1 = vld [vmem:[%s1503_s1 + $0x78] sm:$0xff]  ;;  %v939_v2 = vld [vmem:[%s1503_s1 + $0x70] sm:$0xff]  ;;  %s881_s15 = smov [#allocation10]  }
   0xf   :  { %78 = vst [vmem:[#allocation2] sm:$0x3] %v880_v0  ;;  %103 = vmatpush.msra.mxu0 %v934_v1  ;;  %201 = vmatpush.msra.mxu3 %v934_v1  ;;  %v946_v3 = vld [vmem:[%s1503_s1 + $0x68] sm:$0xff]  ;;  %v953_v4 = vld [vmem:[%s1503_s1 + $0x60] sm:$0xff]  ;;  %v962_v6 = vld [vmem:[%s1503_s1 + $0x58] sm:$0xff]  ;;  %s712_s3 = sshll.u32 %s881_s15, 4  ;;  %s713_s3 = int_to_ptr.vmem [resolvable:$true] %s712_s3 }
  0x10   :  { %79 = vst [vmem:[#allocation3] sm:$0x3] %v880_v0  ;;  %v956_v5 = vld [vmem:[#allocation4 + $0x78] sm:$0xff]  ;;  %v965_v7 = vld [vmem:[#allocation4 + $0x70] sm:$0xff]  ;;  %v970_v9 = vld [vmem:[#allocation4 + $0x68] sm:$0xff]  ;;  %s714_s17 = sshll.u32 %s1509_s7, 4  ;;  %s715_s17 = int_to_ptr.hbm [resolvable:$true] %s714_s17 }
  0x11   :  { %104 = vmatpush.msra.mxu0 %v939_v2  ;;  %202 = vmatpush.msra.mxu3 %v939_v2  ;;  %v967_v8 = vld [vmem:[#allocation7 + $0x78] sm:$0xff]  ;;  %v973_v10 = vld [vmem:[#allocation7 + $0x70] sm:$0xff]  ;;  %v982_v12 = vld [vmem:[#allocation7 + $0x68] sm:$0xff] }
  0x12   :  { %177 = vmatpush.msra.mxu2 %v956_v5  ;;  %157 = vmatpush.msra.mxu1 %v967_v8  ;;  %v978_v11 = vld [vmem:[%s1503_s1 + $0x50] sm:$0xff]  ;;  %v985_v13 = vld [vmem:[#allocation4 + $0x60] sm:$0xff]  ;;  %v1003_v17 = vld [vmem:[#allocation4 + $0x58] sm:$0xff] }
  0x13   :  { %105 = vmatpush.msra.mxu0 %v946_v3  ;;  %203 = vmatpush.msra.mxu3 %v946_v3  ;;  %v991_v14 = vld [vmem:[%s1503_s1 + $0x48] sm:$0xff]  ;;  %v1001_v16 = vld [vmem:[%s1503_s1 + $0x40] sm:$0xff]  ;;  %v1011_v19 = vld [vmem:[#allocation4 + $0x50] sm:$0xff] }
  0x14   :  { %178 = vmatpush.msra.mxu2 %v965_v7  ;;  %158 = vmatpush.msra.mxu1 %v973_v10  ;;  %v995_v15 = vld [vmem:[#allocation7 + $0x60] sm:$0xff]  ;;  %v1008_v18 = vld [vmem:[#allocation7 + $0x58] sm:$0xff]  ;;  %v1021_v21 = vld [vmem:[#allocation7 + $0x50] sm:$0xff] }
  0x15   :  { %106 = vmatpush.msra.mxu0 %v953_v4  ;;  %204 = vmatpush.msra.mxu3 %v953_v4  ;;  %v1017_v20 = vld [vmem:[%s1503_s1 + $0x38] sm:$0xff]  ;;  %v1024_v22 = vld [vmem:[#allocation4 + $0x48] sm:$0xff]  ;;  %v1037_v25 = vld [vmem:[#allocation4 + $0x40] sm:$0xff] }
  0x16   :  { %179 = vmatpush.msra.mxu2 %v970_v9  ;;  %159 = vmatpush.msra.mxu1 %v982_v12  ;;  %v1030_v23 = vld [vmem:[%s1503_s1 + $0x30] sm:$0xff]  ;;  %v1043_v26 = vld [vmem:[%s1503_s1 + $0x28] sm:$0xff]  ;;  %v1050_v28 = vld [vmem:[#allocation4 + $0x38] sm:$0xff] }
  0x17   :  { %107 = vmatpush.msra.mxu0 %v962_v6  ;;  %205 = vmatpush.msra.mxu3 %v962_v6  ;;  %v1034_v24 = vld [vmem:[#allocation7 + $0x48] sm:$0xff]  ;;  %v1047_v27 = vld [vmem:[#allocation7 + $0x40] sm:$0xff]  ;;  %v1061_v30 = vld [vmem:[#allocation4 + $0x30] sm:$0xff] }
  0x18   :  { %180 = vmatpush.msra.mxu2 %v985_v13  ;;  %160 = vmatpush.msra.mxu1 %v995_v15  ;;  %v1056_v29 = vld [vmem:[%s1503_s1 + $0x20] sm:$0xff]  ;;  %v1067_v31 = vld [vmem:[%s1503_s1 + $0x18] sm:$0xff]  ;;  %v1072_v32 = vld [vmem:[#allocation4 + $0x28] sm:$0xff] }
  0x19   :  { %108 = vmatpush.msra.mxu0 %v978_v11  ;;  %206 = vmatpush.msra.mxu3 %v978_v11  ;;  %v1077_v33 = vld [vmem:[%s1503_s1 + $0x10] sm:$0xff]  ;;  %v1085_v34 = vld [vmem:[%s1503_s1 + $0x8] sm:$0xff]  ;;  %v1093_v35 = vld [vmem:[%s1503_s1] sm:$0xff] }
  0x1a   :  { %181 = vmatpush.msra.mxu2 %v1003_v17  ;;  %161 = vmatpush.msra.mxu1 %v1008_v18  ;;  %v84_v36 = vld [vmem:[#allocation2] sm:$0x3]  ;;  %v1118_v38 = vld [vmem:[#allocation4 + $0x20] sm:$0xff]  ;;  %v1122_v39 = vld [vmem:[#allocation7 + $0x30] sm:$0xff] }
  0x1b   :  { %109 = vmatpush.msra.mxu0 %v991_v14  ;;  %207 = vmatpush.msra.mxu3 %v991_v14  ;;  %v1116_v37 = vld [vmem:[#allocation7 + $0x38] sm:$0xff]  ;;  %v1130_v41 = vld [vmem:[#allocation7 + $0x28] sm:$0xff]  ;;  %v1132_v42 = vld [vmem:[#allocation4 + $0x10] sm:$0xff] }
  0x1c   :  { %182 = vmatpush.msra.mxu2 %v1011_v19  ;;  %162 = vmatpush.msra.mxu1 %v1021_v21  ;;  %v1124_v40 = vld [vmem:[#allocation4 + $0x18] sm:$0xff]  ;;  %v1134_v43 = vld [vmem:[#allocation7 + $0x20] sm:$0xff]  ;;  %v1136_v44 = vld [vmem:[#allocation4 + $0x8] sm:$0xff] }
  0x1d   :  { %110 = vmatpush.msra.mxu0 %v1001_v16  ;;  %208 = vmatpush.msra.mxu3 %v1001_v16  ;;  %v1142_v45 = vld [vmem:[#allocation7 + $0x18] sm:$0xff]  ;;  %v1144_v46 = vld [vmem:[#allocation4] sm:$0xff]  ;;  %v1154_v47 = vld [vmem:[#allocation7 + $0x10] sm:$0xff] }
  0x1e   :  { %183 = vmatpush.msra.mxu2 %v1024_v22  ;;  %163 = vmatpush.msra.mxu1 %v1034_v24  ;;  %v1156_v48 = vld [vmem:[#allocation7 + $0x8] sm:$0xff]  ;;  %v1162_v49 = vld [vmem:[#allocation7] sm:$0xff]  ;;  %v85_v50 = vld [vmem:[#allocation3] sm:$0x3] }
  0x1f   :  { %111 = vmatpush.msra.mxu0 %v1017_v20  ;;  %209 = vmatpush.msra.mxu3 %v1017_v20  ;;  %v86_v51 = vld [vmem:[%s1502_s0] sm:$0x3]  ;;  %v725_v56 = vld [vmem:[%s1502_s0 + $0x2] sm:$0x3] }
  0x20   :  { %184 = vmatpush.msra.mxu2 %v1037_v25  ;;  %164 = vmatpush.msra.mxu1 %v1047_v27  ;;  %v1276_v57 = vld [vmem:[%s1506_s4] ss:$0 sm:$0xff] }
  0x21   :  { %112 = vmatpush.msra.mxu0 %v1030_v23  ;;  %210 = vmatpush.msra.mxu3 %v1030_v23 }
  0x22   :  { %185 = vmatpush.msra.mxu2 %v1050_v28  ;;  %165 = vmatpush.msra.mxu1 %v1116_v37 }
  0x23   :  { %113 = vmatpush.msra.mxu0 %v1043_v26  ;;  %211 = vmatpush.msra.mxu3 %v1043_v26 }
  0x24   :  { %186 = vmatpush.msra.mxu2 %v1061_v30  ;;  %166 = vmatpush.msra.mxu1 %v1122_v39 }
  0x25   :  { %114 = vmatpush.msra.mxu0 %v1056_v29  ;;  %212 = vmatpush.msra.mxu3 %v1056_v29 }
  0x26   :  { %187 = vmatpush.msra.mxu2 %v1072_v32  ;;  %167 = vmatpush.msra.mxu1 %v1130_v41 }
  0x27   :  { %115 = vmatpush.msra.mxu0 %v1067_v31  ;;  %213 = vmatpush.msra.mxu3 %v1067_v31 }
  0x28   :  { %188 = vmatpush.msra.mxu2 %v1118_v38  ;;  %168 = vmatpush.msra.mxu1 %v1134_v43 }
  0x29   :  { %116 = vmatpush.msra.mxu0 %v1077_v33  ;;  %214 = vmatpush.msra.mxu3 %v1077_v33 }
  0x2a   :  { %189 = vmatpush.msra.mxu2 %v1124_v40  ;;  %169 = vmatpush.msra.mxu1 %v1142_v45 }
  0x2b   :  { %117 = vmatpush.msra.mxu0 %v1085_v34  ;;  %215 = vmatpush.msra.mxu3 %v1085_v34 }
  0x2c   :  { %190 = vmatpush.msra.mxu2 %v1132_v42  ;;  %170 = vmatpush.msra.mxu1 %v1154_v47 }
  0x2d   :  { %118 = vmatpush.msra.mxu0 %v1093_v35  ;;  %216 = vmatpush.msra.mxu3 %v1093_v35 }
  0x2e   :  { %119 = vmatmul.f32.vlgmr.msra.gmra.mxu0 %v84_v36  ;;  %191 = vmatpush.msra.mxu2 %v1136_v44 }
  0x2f   :  { %223 = vmatpush.msrb.mxu0 %v967_v8  ;;  %289 = vmatpush.msrb.mxu3 %v967_v8 }
  0x30   :  { %192 = vmatpush.msra.mxu2 %v1144_v46  ;;  %171 = vmatpush.msra.mxu1 %v1156_v48 }
  0x31   :  { %224 = vmatpush.msrb.mxu0 %v973_v10  ;;  %290 = vmatpush.msrb.mxu3 %v973_v10 }
  0x32   :  { %267 = vmatpush.msrb.mxu2 %v934_v1  ;;  %172 = vmatpush.msra.mxu1 %v1162_v49 }
  0x33   :  { %225 = vmatpush.msrb.mxu0 %v982_v12  ;;  %291 = vmatpush.msrb.mxu3 %v982_v12 }
  0x34   :  { %268 = vmatpush.msrb.mxu2 %v939_v2  ;;  %173 = vmatmul.f32.vlgmr.msra.gmra.mxu1 %v85_v50 }
  0x35   :  { %226 = vmatpush.msrb.mxu0 %v995_v15  ;;  %292 = vmatpush.msrb.mxu3 %v995_v15 }
  0x36   :  { %269 = vmatpush.msrb.mxu2 %v946_v3  ;;  %243 = vmatpush.msrb.mxu1 %v956_v5 }
  0x37   :  { %227 = vmatpush.msrb.mxu0 %v1008_v18  ;;  %293 = vmatpush.msrb.mxu3 %v1008_v18 }
  0x38   :  { %270 = vmatpush.msrb.mxu2 %v953_v4  ;;  %244 = vmatpush.msrb.mxu1 %v965_v7 }
  0x39   :  { %228 = vmatpush.msrb.mxu0 %v1021_v21  ;;  %294 = vmatpush.msrb.mxu3 %v1021_v21 }
  0x3a   :  { %271 = vmatpush.msrb.mxu2 %v962_v6  ;;  %245 = vmatpush.msrb.mxu1 %v970_v9 }
  0x3b   :  { %229 = vmatpush.msrb.mxu0 %v1034_v24  ;;  %295 = vmatpush.msrb.mxu3 %v1034_v24 }
  0x3c   :  { %272 = vmatpush.msrb.mxu2 %v978_v11  ;;  %246 = vmatpush.msrb.mxu1 %v985_v13 }
  0x3d   :  { %230 = vmatpush.msrb.mxu0 %v1047_v27  ;;  %296 = vmatpush.msrb.mxu3 %v1047_v27 }
  0x3e   :  { %273 = vmatpush.msrb.mxu2 %v991_v14  ;;  %247 = vmatpush.msrb.mxu1 %v1003_v17 }
  0x3f   :  { %231 = vmatpush.msrb.mxu0 %v1116_v37  ;;  %297 = vmatpush.msrb.mxu3 %v1116_v37 }
  0x40   :  { %274 = vmatpush.msrb.mxu2 %v1001_v16  ;;  %248 = vmatpush.msrb.mxu1 %v1011_v19 }
  0x41   :  { %232 = vmatpush.msrb.mxu0 %v1122_v39  ;;  %298 = vmatpush.msrb.mxu3 %v1122_v39 }
  0x42   :  { %275 = vmatpush.msrb.mxu2 %v1017_v20  ;;  %249 = vmatpush.msrb.mxu1 %v1024_v22 }
  0x43   :  { %233 = vmatpush.msrb.mxu0 %v1130_v41  ;;  %299 = vmatpush.msrb.mxu3 %v1130_v41 }
  0x44   :  { %276 = vmatpush.msrb.mxu2 %v1030_v23  ;;  %250 = vmatpush.msrb.mxu1 %v1037_v25 }
  0x45   :  { %234 = vmatpush.msrb.mxu0 %v1134_v43  ;;  %300 = vmatpush.msrb.mxu3 %v1134_v43 }
  0x46   :  { %277 = vmatpush.msrb.mxu2 %v1043_v26  ;;  %251 = vmatpush.msrb.mxu1 %v1050_v28 }
  0x47   :  { %235 = vmatpush.msrb.mxu0 %v1142_v45  ;;  %301 = vmatpush.msrb.mxu3 %v1142_v45 }
  0x48   :  { %278 = vmatpush.msrb.mxu2 %v1056_v29  ;;  %252 = vmatpush.msrb.mxu1 %v1061_v30 }
  0x49   :  { %236 = vmatpush.msrb.mxu0 %v1154_v47  ;;  %302 = vmatpush.msrb.mxu3 %v1154_v47 }
  0x4a   :  { %279 = vmatpush.msrb.mxu2 %v1067_v31  ;;  %253 = vmatpush.msrb.mxu1 %v1072_v32 }
  0x4b   :  { %237 = vmatpush.msrb.mxu0 %v1156_v48  ;;  %303 = vmatpush.msrb.mxu3 %v1156_v48 }
  0x4c   :  { %280 = vmatpush.msrb.mxu2 %v1077_v33  ;;  %254 = vmatpush.msrb.mxu1 %v1118_v38 }
  0x4d   :  { %238 = vmatpush.msrb.mxu0 %v1162_v49  ;;  %304 = vmatpush.msrb.mxu3 %v1162_v49 }
  0x4e   :  { %281 = vmatpush.msrb.mxu2 %v1085_v34  ;;  %255 = vmatpush.msrb.mxu1 %v1124_v40 }
  0x4f   :  { %309 = vmatpush.msra.mxu0 %v956_v5 }
  0x50   :  { %282 = vmatpush.msrb.mxu2 %v1093_v35  ;;  %256 = vmatpush.msrb.mxu1 %v1132_v42 }
  0x51   :  { %310 = vmatpush.msra.mxu0 %v965_v7 }
  0x52   :  { %257 = vmatpush.msrb.mxu1 %v1136_v44 }
  0x53   :  { %311 = vmatpush.msra.mxu0 %v970_v9 }
  0x54   :  { %258 = vmatpush.msrb.mxu1 %v1144_v46 }
  0x55   :  { %312 = vmatpush.msra.mxu0 %v985_v13 }
  0x56   :  { %333 = vmatpush.msra.mxu1 %v934_v1 }
  0x57   :  { %313 = vmatpush.msra.mxu0 %v1003_v17 }
  0x58   :  { %334 = vmatpush.msra.mxu1 %v939_v2 }
  0x59   :  { %314 = vmatpush.msra.mxu0 %v1011_v19 }
  0x5a   :  { %335 = vmatpush.msra.mxu1 %v946_v3 }
  0x5b   :  { %315 = vmatpush.msra.mxu0 %v1024_v22 }
  0x5c   :  { %336 = vmatpush.msra.mxu1 %v953_v4 }
  0x5d   :  { %316 = vmatpush.msra.mxu0 %v1037_v25 }
  0x5e   :  { %337 = vmatpush.msra.mxu1 %v962_v6 }
  0x5f   :  { %317 = vmatpush.msra.mxu0 %v1050_v28 }
  0x60   :  { %338 = vmatpush.msra.mxu1 %v978_v11 }
  0x61   :  { %318 = vmatpush.msra.mxu0 %v1061_v30 }
  0x62   :  { %339 = vmatpush.msra.mxu1 %v991_v14 }
  0x63   :  { %319 = vmatpush.msra.mxu0 %v1072_v32 }
  0x64   :  { %340 = vmatpush.msra.mxu1 %v1001_v16 }
  0x65   :  { %320 = vmatpush.msra.mxu0 %v1118_v38 }
  0x66   :  { %341 = vmatpush.msra.mxu1 %v1017_v20 }
  0x67   :  { %321 = vmatpush.msra.mxu0 %v1124_v40 }
  0x68   :  { %342 = vmatpush.msra.mxu1 %v1030_v23 }
  0x69   :  { %322 = vmatpush.msra.mxu0 %v1132_v42 }
  0x6a   :  { %343 = vmatpush.msra.mxu1 %v1043_v26 }
  0x6b   :  { %323 = vmatpush.msra.mxu0 %v1136_v44 }
  0x6c   :  { %344 = vmatpush.msra.mxu1 %v1056_v29 }
  0x6d   :  { %324 = vmatpush.msra.mxu0 %v1144_v46 }
  0x6e   :  { %345 = vmatpush.msra.mxu1 %v1067_v31 }
  0x70   :  { %346 = vmatpush.msra.mxu1 %v1077_v33 }
  0x72   :  { %347 = vmatpush.msra.mxu1 %v1085_v34 }
  0x74   :  { %348 = vmatpush.msra.mxu1 %v1093_v35 }
  0xab   :  { %v120_v52 = vpop.f32.mrf.mxu0 }
  0xac   :  { %v123_v53 = vadd.f32 %v120_v52, %v86_v51  ;;  %v726_v52 = vld [vmem:[%s1502_s0 + $0x4] sm:$0x3] }
  0xae   :  { %741 = vtanh.f32 %v123_v53 }
  0xb1   :  { %v174_v55 = vpop.f32.mrf.mxu1 }
  0xb4   :  { %v742_v54 = vpop.eup %741 }
  0xb5   :  { %193 = vmatmul.f32.vlgmr.msra.gmra.mxu2 %v742_v54  ;;  %217 = vmatmul.f32.vlgmr.msra.gmra.mxu3 %v742_v54 }
  0xb6   :  { %375 = vmatpush.msra.mxu3 %v956_v5  ;;  %355 = vmatpush.msra.mxu2 %v967_v8 }
  0xb8   :  { %376 = vmatpush.msra.mxu3 %v965_v7  ;;  %356 = vmatpush.msra.mxu2 %v973_v10 }
  0xba   :  { %377 = vmatpush.msra.mxu3 %v970_v9  ;;  %357 = vmatpush.msra.mxu2 %v982_v12 }
  0xbc   :  { %378 = vmatpush.msra.mxu3 %v985_v13  ;;  %358 = vmatpush.msra.mxu2 %v995_v15 }
  0xbe   :  { %379 = vmatpush.msra.mxu3 %v1003_v17  ;;  %359 = vmatpush.msra.mxu2 %v1008_v18 }
  0xc0   :  { %380 = vmatpush.msra.mxu3 %v1011_v19  ;;  %360 = vmatpush.msra.mxu2 %v1021_v21 }
  0xc2   :  { %381 = vmatpush.msra.mxu3 %v1024_v22  ;;  %361 = vmatpush.msra.mxu2 %v1034_v24 }
  0xc4   :  { %382 = vmatpush.msra.mxu3 %v1037_v25  ;;  %362 = vmatpush.msra.mxu2 %v1047_v27 }
  0xc6   :  { %383 = vmatpush.msra.mxu3 %v1050_v28  ;;  %363 = vmatpush.msra.mxu2 %v1116_v37 }
  0xc8   :  { %384 = vmatpush.msra.mxu3 %v1061_v30  ;;  %364 = vmatpush.msra.mxu2 %v1122_v39 }
  0xca   :  { %385 = vmatpush.msra.mxu3 %v1072_v32  ;;  %365 = vmatpush.msra.mxu2 %v1130_v41 }
  0xcc   :  { %386 = vmatpush.msra.mxu3 %v1118_v38  ;;  %366 = vmatpush.msra.mxu2 %v1134_v43 }
  0xce   :  { %387 = vmatpush.msra.mxu3 %v1124_v40  ;;  %367 = vmatpush.msra.mxu2 %v1142_v45 }
  0xd0   :  { %388 = vmatpush.msra.mxu3 %v1132_v42  ;;  %368 = vmatpush.msra.mxu2 %v1154_v47 }
  0xd2   :  { %389 = vmatpush.msra.mxu3 %v1136_v44  ;;  %369 = vmatpush.msra.mxu2 %v1156_v48 }
  0xd4   :  { %390 = vmatpush.msra.mxu3 %v1144_v46  ;;  %370 = vmatpush.msra.mxu2 %v1162_v49 }
 0x138   :  { %v194_v58 = vpop.f32.mrf.mxu2  ;;  %v218_v59 = vpop.f32.mrf.mxu3 }
 0x139   :  { %v195_v60 = vadd.f32 %v194_v58, %v174_v55  ;;  %v221_v61 = vadd.f32 %v725_v56, %v218_v59  ;;  %v727_v59 = vld [vmem:[%s1502_s0 + $0x6] sm:$0x3] }
 0x13b   :  { %v197_v62 = vadd.f32 %v1276_v57, %v195_v60  ;;  %743 = vtanh.f32 %v221_v61 }
 0x13d   :  { %745 = vtanh.f32 %v197_v62 }
 0x141   :  { %v744_v63 = vpop.eup %743 }
 0x142   :  { %259 = vmatmul.f32.vlgmr.msrb.gmra.mxu1 %v744_v63  ;;  %283 = vmatmul.f32.vlgmr.msrb.gmra.mxu2 %v744_v63 }
 0x143   :  { %v746_v0 = vpop.eup %745  ;;  %441 = vmatpush.msrb.mxu2 %v956_v5  ;;  %421 = vmatpush.msrb.mxu1 %v967_v8 }
 0x144   :  { %239 = vmatmul.f32.vlgmr.msrb.gmra.mxu0 %v746_v0 }
 0x145   :  { %399 = vmatpush.msrb.mxu0 %v934_v1  ;;  %442 = vmatpush.msrb.mxu2 %v965_v7 }
 0x146   :  { %422 = vmatpush.msrb.mxu1 %v973_v10 }
 0x147   :  { %400 = vmatpush.msrb.mxu0 %v939_v2  ;;  %443 = vmatpush.msrb.mxu2 %v970_v9 }
 0x148   :  { %423 = vmatpush.msrb.mxu1 %v982_v12 }
 0x149   :  { %401 = vmatpush.msrb.mxu0 %v946_v3  ;;  %444 = vmatpush.msrb.mxu2 %v985_v13 }
 0x14a   :  { %424 = vmatpush.msrb.mxu1 %v995_v15 }
 0x14b   :  { %402 = vmatpush.msrb.mxu0 %v953_v4  ;;  %445 = vmatpush.msrb.mxu2 %v1003_v17 }
 0x14c   :  { %425 = vmatpush.msrb.mxu1 %v1008_v18 }
 0x14d   :  { %403 = vmatpush.msrb.mxu0 %v962_v6  ;;  %446 = vmatpush.msrb.mxu2 %v1011_v19 }
 0x14e   :  { %426 = vmatpush.msrb.mxu1 %v1021_v21 }
 0x14f   :  { %404 = vmatpush.msrb.mxu0 %v978_v11  ;;  %447 = vmatpush.msrb.mxu2 %v1024_v22 }
 0x150   :  { %427 = vmatpush.msrb.mxu1 %v1034_v24 }
 0x151   :  { %405 = vmatpush.msrb.mxu0 %v991_v14  ;;  %448 = vmatpush.msrb.mxu2 %v1037_v25 }
 0x152   :  { %428 = vmatpush.msrb.mxu1 %v1047_v27 }
 0x153   :  { %406 = vmatpush.msrb.mxu0 %v1001_v16  ;;  %449 = vmatpush.msrb.mxu2 %v1050_v28 }
 0x154   :  { %429 = vmatpush.msrb.mxu1 %v1116_v37 }
 0x155   :  { %407 = vmatpush.msrb.mxu0 %v1017_v20  ;;  %450 = vmatpush.msrb.mxu2 %v1061_v30 }
 0x156   :  { %430 = vmatpush.msrb.mxu1 %v1122_v39 }
 0x157   :  { %408 = vmatpush.msrb.mxu0 %v1030_v23  ;;  %451 = vmatpush.msrb.mxu2 %v1072_v32 }
 0x158   :  { %431 = vmatpush.msrb.mxu1 %v1130_v41 }
 0x159   :  { %409 = vmatpush.msrb.mxu0 %v1043_v26  ;;  %452 = vmatpush.msrb.mxu2 %v1118_v38 }
 0x15a   :  { %432 = vmatpush.msrb.mxu1 %v1134_v43 }
 0x15b   :  { %410 = vmatpush.msrb.mxu0 %v1056_v29  ;;  %453 = vmatpush.msrb.mxu2 %v1124_v40 }
 0x15c   :  { %433 = vmatpush.msrb.mxu1 %v1142_v45 }
 0x15d   :  { %411 = vmatpush.msrb.mxu0 %v1067_v31  ;;  %454 = vmatpush.msrb.mxu2 %v1132_v42 }
 0x15e   :  { %434 = vmatpush.msrb.mxu1 %v1154_v47 }
 0x15f   :  { %412 = vmatpush.msrb.mxu0 %v1077_v33  ;;  %455 = vmatpush.msrb.mxu2 %v1136_v44 }
 0x160   :  { %435 = vmatpush.msrb.mxu1 %v1156_v48 }
 0x161   :  { %413 = vmatpush.msrb.mxu0 %v1085_v34  ;;  %456 = vmatpush.msrb.mxu2 %v1144_v46 }
 0x162   :  { %436 = vmatpush.msrb.mxu1 %v1162_v49 }
 0x163   :  { %414 = vmatpush.msrb.mxu0 %v1093_v35 }
 0x1bf   :  { %v260_v36 = vpop.f32.mrf.mxu1 }
 0x1c1   :  { %v240_v50 = vpop.f32.mrf.mxu0 }
 0x1c2   :  { %v261_v51 = vadd.f32 %v260_v36, %v240_v50 }
 0x1c4   :  { %v263_v53 = vadd.f32 %v1276_v57, %v261_v51 }
 0x1c5   :  { %v284_v54 = vpop.f32.mrf.mxu2 }
 0x1c6   :  { %747 = vtanh.f32 %v263_v53  ;;  %v287_v55 = vadd.f32 %v726_v52, %v284_v54  ;;  %v728_v52 = vld [vmem:[%s1502_s0 + $0x8] sm:$0x3] }
 0x1c8   :  { %749 = vtanh.f32 %v287_v55 }
 0x1cc   :  { %v748_v56 = vpop.eup %747 }
 0x1cd   :  { %305 = vmatmul.f32.vlgmr.msrb.gmra.mxu3 %v748_v56 }
 0x1ce   :  { %v750_v58 = vpop.eup %749  ;;  %465 = vmatpush.msrb.mxu3 %v934_v1 }
 0x1cf   :  { %325 = vmatmul.f32.vlgmr.msra.gmra.mxu0 %v750_v58  ;;  %349 = vmatmul.f32.vlgmr.msra.gmra.mxu1 %v750_v58 }
 0x1d0   :  { %466 = vmatpush.msrb.mxu3 %v939_v2  ;;  %507 = vmatpush.msra.mxu1 %v956_v5 }
 0x1d1   :  { %487 = vmatpush.msra.mxu0 %v967_v8 }
 0x1d2   :  { %467 = vmatpush.msrb.mxu3 %v946_v3  ;;  %508 = vmatpush.msra.mxu1 %v965_v7 }
 0x1d3   :  { %488 = vmatpush.msra.mxu0 %v973_v10 }
 0x1d4   :  { %468 = vmatpush.msrb.mxu3 %v953_v4  ;;  %509 = vmatpush.msra.mxu1 %v970_v9 }
 0x1d5   :  { %489 = vmatpush.msra.mxu0 %v982_v12 }
 0x1d6   :  { %469 = vmatpush.msrb.mxu3 %v962_v6  ;;  %510 = vmatpush.msra.mxu1 %v985_v13 }
 0x1d7   :  { %490 = vmatpush.msra.mxu0 %v995_v15 }
 0x1d8   :  { %470 = vmatpush.msrb.mxu3 %v978_v11  ;;  %511 = vmatpush.msra.mxu1 %v1003_v17 }
 0x1d9   :  { %491 = vmatpush.msra.mxu0 %v1008_v18 }
 0x1da   :  { %471 = vmatpush.msrb.mxu3 %v991_v14  ;;  %512 = vmatpush.msra.mxu1 %v1011_v19 }
 0x1db   :  { %492 = vmatpush.msra.mxu0 %v1021_v21 }
 0x1dc   :  { %472 = vmatpush.msrb.mxu3 %v1001_v16  ;;  %513 = vmatpush.msra.mxu1 %v1024_v22 }
 0x1dd   :  { %493 = vmatpush.msra.mxu0 %v1034_v24 }
 0x1de   :  { %473 = vmatpush.msrb.mxu3 %v1017_v20  ;;  %514 = vmatpush.msra.mxu1 %v1037_v25 }
 0x1df   :  { %494 = vmatpush.msra.mxu0 %v1047_v27 }
 0x1e0   :  { %474 = vmatpush.msrb.mxu3 %v1030_v23  ;;  %515 = vmatpush.msra.mxu1 %v1050_v28 }
 0x1e1   :  { %495 = vmatpush.msra.mxu0 %v1116_v37 }
 0x1e2   :  { %475 = vmatpush.msrb.mxu3 %v1043_v26  ;;  %516 = vmatpush.msra.mxu1 %v1061_v30 }
 0x1e3   :  { %496 = vmatpush.msra.mxu0 %v1122_v39 }
 0x1e4   :  { %476 = vmatpush.msrb.mxu3 %v1056_v29  ;;  %517 = vmatpush.msra.mxu1 %v1072_v32 }
 0x1e5   :  { %497 = vmatpush.msra.mxu0 %v1130_v41 }
 0x1e6   :  { %477 = vmatpush.msrb.mxu3 %v1067_v31  ;;  %518 = vmatpush.msra.mxu1 %v1118_v38 }
 0x1e7   :  { %498 = vmatpush.msra.mxu0 %v1134_v43 }
 0x1e8   :  { %478 = vmatpush.msrb.mxu3 %v1077_v33  ;;  %519 = vmatpush.msra.mxu1 %v1124_v40 }
 0x1e9   :  { %499 = vmatpush.msra.mxu0 %v1142_v45 }
 0x1ea   :  { %479 = vmatpush.msrb.mxu3 %v1085_v34  ;;  %520 = vmatpush.msra.mxu1 %v1132_v42 }
 0x1eb   :  { %500 = vmatpush.msra.mxu0 %v1154_v47 }
 0x1ec   :  { %480 = vmatpush.msrb.mxu3 %v1093_v35  ;;  %521 = vmatpush.msra.mxu1 %v1136_v44 }
 0x1ed   :  { %501 = vmatpush.msra.mxu0 %v1156_v48 }
 0x1ee   :  { %522 = vmatpush.msra.mxu1 %v1144_v46 }
 0x1ef   :  { %502 = vmatpush.msra.mxu0 %v1162_v49 }
 0x24c   :  { %v350_v60 = vpop.f32.mrf.mxu1  ;;  %v326_v62 = vpop.f32.mrf.mxu0 }
 0x24d   :  { %v353_v61 = vadd.f32 %v727_v59, %v350_v60 }
 0x24f   :  { %751 = vtanh.f32 %v353_v61 }
 0x250   :  { %v306_v63 = vpop.f32.mrf.mxu3 }
 0x251   :  { %v327_v0 = vadd.f32 %v326_v62, %v306_v63  ;;  %v740_v62 = vld [vmem:[%s1508_s6] ss:$0 sm:$0xff] }
 0x253   :  { %v329_v36 = vadd.f32 %v1276_v57, %v327_v0 }
 0x255   :  { %v752_v50 = vpop.eup %751  ;;  %753 = vtanh.f32 %v329_v36 }
 0x256   :  { %391 = vmatmul.f32.vlgmr.msra.gmra.mxu3 %v752_v50  ;;  %415 = vmatmul.f32.vlgmr.msrb.gmra.mxu0 %v752_v50 }
 0x257   :  { %573 = vmatpush.msrb.mxu0 %v956_v5  ;;  %553 = vmatpush.msra.mxu3 %v967_v8 }
 0x259   :  { %574 = vmatpush.msrb.mxu0 %v965_v7  ;;  %554 = vmatpush.msra.mxu3 %v973_v10 }
 0x25b   :  { %v754_v51 = vpop.eup %753  ;;  %575 = vmatpush.msrb.mxu0 %v970_v9  ;;  %555 = vmatpush.msra.mxu3 %v982_v12 }
 0x25c   :  { %371 = vmatmul.f32.vlgmr.msra.gmra.mxu2 %v754_v51 }
 0x25d   :  { %531 = vmatpush.msra.mxu2 %v934_v1  ;;  %576 = vmatpush.msrb.mxu0 %v985_v13 }
 0x25e   :  { %556 = vmatpush.msra.mxu3 %v995_v15 }
 0x25f   :  { %532 = vmatpush.msra.mxu2 %v939_v2  ;;  %577 = vmatpush.msrb.mxu0 %v1003_v17 }
 0x260   :  { %557 = vmatpush.msra.mxu3 %v1008_v18 }
 0x261   :  { %533 = vmatpush.msra.mxu2 %v946_v3  ;;  %578 = vmatpush.msrb.mxu0 %v1011_v19 }
 0x262   :  { %558 = vmatpush.msra.mxu3 %v1021_v21 }
 0x263   :  { %534 = vmatpush.msra.mxu2 %v953_v4  ;;  %579 = vmatpush.msrb.mxu0 %v1024_v22 }
 0x264   :  { %559 = vmatpush.msra.mxu3 %v1034_v24 }
 0x265   :  { %535 = vmatpush.msra.mxu2 %v962_v6  ;;  %580 = vmatpush.msrb.mxu0 %v1037_v25 }
 0x266   :  { %560 = vmatpush.msra.mxu3 %v1047_v27 }
 0x267   :  { %536 = vmatpush.msra.mxu2 %v978_v11  ;;  %581 = vmatpush.msrb.mxu0 %v1050_v28 }
 0x268   :  { %561 = vmatpush.msra.mxu3 %v1116_v37 }
 0x269   :  { %537 = vmatpush.msra.mxu2 %v991_v14  ;;  %582 = vmatpush.msrb.mxu0 %v1061_v30 }
 0x26a   :  { %562 = vmatpush.msra.mxu3 %v1122_v39 }
 0x26b   :  { %538 = vmatpush.msra.mxu2 %v1001_v16  ;;  %583 = vmatpush.msrb.mxu0 %v1072_v32 }
 0x26c   :  { %563 = vmatpush.msra.mxu3 %v1130_v41 }
 0x26d   :  { %539 = vmatpush.msra.mxu2 %v1017_v20  ;;  %584 = vmatpush.msrb.mxu0 %v1118_v38 }
 0x26e   :  { %564 = vmatpush.msra.mxu3 %v1134_v43 }
 0x26f   :  { %540 = vmatpush.msra.mxu2 %v1030_v23  ;;  %585 = vmatpush.msrb.mxu0 %v1124_v40 }
 0x270   :  { %565 = vmatpush.msra.mxu3 %v1142_v45 }
 0x271   :  { %541 = vmatpush.msra.mxu2 %v1043_v26  ;;  %586 = vmatpush.msrb.mxu0 %v1132_v42 }
 0x272   :  { %566 = vmatpush.msra.mxu3 %v1154_v47 }
 0x273   :  { %542 = vmatpush.msra.mxu2 %v1056_v29  ;;  %587 = vmatpush.msrb.mxu0 %v1136_v44 }
 0x274   :  { %567 = vmatpush.msra.mxu3 %v1156_v48 }
 0x275   :  { %543 = vmatpush.msra.mxu2 %v1067_v31  ;;  %588 = vmatpush.msrb.mxu0 %v1144_v46 }
 0x276   :  { %568 = vmatpush.msra.mxu3 %v1162_v49 }
 0x277   :  { %544 = vmatpush.msra.mxu2 %v1077_v33 }
 0x279   :  { %545 = vmatpush.msra.mxu2 %v1085_v34 }
 0x27b   :  { %546 = vmatpush.msra.mxu2 %v1093_v35 }
 0x2d3   :  { %v416_v53 = vpop.f32.mrf.mxu0 }
 0x2d4   :  { %v419_v54 = vadd.f32 %v728_v52, %v416_v53 }
 0x2d6   :  { %755 = vtanh.f32 %v419_v54 }
 0x2d9   :  { %v392_v56 = vpop.f32.mrf.mxu3 }
 0x2dc   :  { %v756_v55 = vpop.eup %755 }
 0x2dd   :  { %457 = vmatmul.f32.vlgmr.msrb.gmra.mxu2 %v756_v55  ;;  %481 = vmatmul.f32.vlgmr.msrb.gmra.mxu3 %v756_v55 }
 0x2de   :  { %639 = vmatpush.msrb.mxu3 %v956_v5  ;;  %619 = vmatpush.msrb.mxu2 %v967_v8 }
 0x2df   :  { %v372_v58 = vpop.f32.mrf.mxu2 }
 0x2e0   :  { %v393_v59 = vadd.f32 %v392_v56, %v372_v58  ;;  %640 = vmatpush.msrb.mxu3 %v965_v7  ;;  %620 = vmatpush.msrb.mxu2 %v973_v10 }
 0x2e2   :  { %v395_v60 = vadd.f32 %v1276_v57, %v393_v59  ;;  %641 = vmatpush.msrb.mxu3 %v970_v9  ;;  %621 = vmatpush.msrb.mxu2 %v982_v12 }
 0x2e4   :  { %757 = vtanh.f32 %v395_v60  ;;  %642 = vmatpush.msrb.mxu3 %v985_v13  ;;  %622 = vmatpush.msrb.mxu2 %v995_v15 }
 0x2e6   :  { %643 = vmatpush.msrb.mxu3 %v1003_v17  ;;  %623 = vmatpush.msrb.mxu2 %v1008_v18 }
 0x2e8   :  { %644 = vmatpush.msrb.mxu3 %v1011_v19  ;;  %624 = vmatpush.msrb.mxu2 %v1021_v21  ;;  %v680_v21 = vld [vmem:[#allocation9 + $0x70] sm:$0xff] }
 0x2ea   :  { %v758_v5 = vpop.eup %757  ;;  %645 = vmatpush.msrb.mxu3 %v1024_v22  ;;  %625 = vmatpush.msrb.mxu2 %v1034_v24  ;;  %v679_v22 = vld [vmem:[#allocation9 + $0x68] sm:$0xff] }
 0x2eb   :  { %437 = vmatmul.f32.vlgmr.msrb.gmra.mxu1 %v758_v5 }
 0x2ec   :  { %597 = vmatpush.msrb.mxu1 %v934_v1  ;;  %646 = vmatpush.msrb.mxu3 %v1037_v25  ;;  %v729_v1 = vld [vmem:[%s1502_s0 + $0xa] sm:$0x3] }
 0x2ed   :  { %626 = vmatpush.msrb.mxu2 %v1047_v27 }
 0x2ee   :  { %598 = vmatpush.msrb.mxu1 %v939_v2  ;;  %647 = vmatpush.msrb.mxu3 %v1050_v28 }
 0x2ef   :  { %627 = vmatpush.msrb.mxu2 %v1116_v37  ;;  %v674_v37 = vld [vmem:[#allocation9 + $0x40] sm:$0xff] }
 0x2f0   :  { %599 = vmatpush.msrb.mxu1 %v946_v3  ;;  %648 = vmatpush.msrb.mxu3 %v1061_v30 }
 0x2f1   :  { %628 = vmatpush.msrb.mxu2 %v1122_v39  ;;  %v672_v39 = vld [vmem:[#allocation9 + $0x30] sm:$0xff] }
 0x2f2   :  { %600 = vmatpush.msrb.mxu1 %v953_v4  ;;  %649 = vmatpush.msrb.mxu3 %v1072_v32  ;;  %v678_v32 = vld [vmem:[#allocation9 + $0x60] sm:$0xff] }
 0x2f3   :  { %629 = vmatpush.msrb.mxu2 %v1130_v41  ;;  %v670_v41 = vld [vmem:[#allocation9 + $0x20] sm:$0xff] }
 0x2f4   :  { %601 = vmatpush.msrb.mxu1 %v962_v6  ;;  %650 = vmatpush.msrb.mxu3 %v1118_v38  ;;  %v673_v38 = vld [vmem:[#allocation9 + $0x38] sm:$0xff] }
 0x2f5   :  { %630 = vmatpush.msrb.mxu2 %v1134_v43  ;;  %v668_v43 = vld [vmem:[#allocation9 + $0x10] sm:$0xff] }
 0x2f6   :  { %602 = vmatpush.msrb.mxu1 %v978_v11  ;;  %651 = vmatpush.msrb.mxu3 %v1124_v40  ;;  %v730_v11 = vld [vmem:[%s1502_s0 + $0xc] sm:$0x3] }
 0x2f7   :  { %631 = vmatpush.msrb.mxu2 %v1142_v45  ;;  %v671_v40 = vld [vmem:[#allocation9 + $0x28] sm:$0xff]  ;;  %v666_v45 = vld [vmem:[#allocation9] sm:$0xff] }
 0x2f8   :  { %603 = vmatpush.msrb.mxu1 %v991_v14  ;;  %652 = vmatpush.msrb.mxu3 %v1132_v42  ;;  %v669_v42 = vld [vmem:[#allocation9 + $0x18] sm:$0xff] }
 0x2f9   :  { %632 = vmatpush.msrb.mxu2 %v1154_v47 }
 0x2fa   :  { %604 = vmatpush.msrb.mxu1 %v1001_v16  ;;  %653 = vmatpush.msrb.mxu3 %v1136_v44  ;;  %v667_v44 = vld [vmem:[#allocation9 + $0x8] sm:$0xff] }
 0x2fb   :  { %633 = vmatpush.msrb.mxu2 %v1156_v48 }
 0x2fc   :  { %605 = vmatpush.msrb.mxu1 %v1017_v20  ;;  %654 = vmatpush.msrb.mxu3 %v1144_v46  ;;  %v681_v20 = vld [vmem:[#allocation9 + $0x78] sm:$0xff] }
 0x2fd   :  { %634 = vmatpush.msrb.mxu2 %v1162_v49 }
 0x2fe   :  { %606 = vmatpush.msrb.mxu1 %v1030_v23  ;;  %v731_v23 = vld [vmem:[%s1502_s0 + $0xe] sm:$0x3] }
 0x300   :  { %607 = vmatpush.msrb.mxu1 %v1043_v26 }
 0x302   :  { %608 = vmatpush.msrb.mxu1 %v1056_v29 }
 0x304   :  { %609 = vmatpush.msrb.mxu1 %v1067_v31 }
 0x306   :  { %610 = vmatpush.msrb.mxu1 %v1077_v33  ;;  %v677_v33 = vld [vmem:[#allocation9 + $0x58] sm:$0xff] }
 0x308   :  { %611 = vmatpush.msrb.mxu1 %v1085_v34  ;;  %v676_v34 = vld [vmem:[#allocation9 + $0x50] sm:$0xff] }
 0x30a   :  { %612 = vmatpush.msrb.mxu1 %v1093_v35  ;;  %v675_v35 = vld [vmem:[#allocation9 + $0x48] sm:$0xff] }
 0x360   :  { %v482_v2 = vpop.f32.mrf.mxu3  ;;  %v458_v4 = vpop.f32.mrf.mxu2 }
 0x361   :  { %v485_v3 = vadd.f32 %v729_v1, %v482_v2 }
 0x363   :  { %759 = vtanh.f32 %v485_v3 }
 0x368   :  { %v438_v6 = vpop.f32.mrf.mxu1 }
 0x369   :  { %v760_v7 = vpop.eup %759  ;;  %v459_v8 = vadd.f32 %v458_v4, %v438_v6 }
 0x36a   :  { %523 = vmatmul.f32.vlgmr.msra.gmra.mxu1 %v760_v7  ;;  %547 = vmatmul.f32.vlgmr.msra.gmra.mxu2 %v760_v7 }
 0x36b   :  { %v461_v9 = vadd.f32 %v1276_v57, %v459_v8 }
 0x36d   :  { %761 = vtanh.f32 %v461_v9 }
 0x373   :  { %v762_v10 = vpop.eup %761 }
 0x374   :  { %503 = vmatmul.f32.vlgmr.msra.gmra.mxu0 %v762_v10 }
 0x375   :  { %686 = vmatpush.msra.mxu0 %v681_v20 }
 0x377   :  { %687 = vmatpush.msra.mxu0 %v680_v21 }
 0x379   :  { %688 = vmatpush.msra.mxu0 %v679_v22 }
 0x37b   :  { %689 = vmatpush.msra.mxu0 %v678_v32 }
 0x37d   :  { %690 = vmatpush.msra.mxu0 %v677_v33 }
 0x37f   :  { %691 = vmatpush.msra.mxu0 %v676_v34 }
 0x381   :  { %692 = vmatpush.msra.mxu0 %v675_v35 }
 0x383   :  { %693 = vmatpush.msra.mxu0 %v674_v37 }
 0x385   :  { %694 = vmatpush.msra.mxu0 %v673_v38 }
 0x387   :  { %695 = vmatpush.msra.mxu0 %v672_v39 }
 0x389   :  { %696 = vmatpush.msra.mxu0 %v671_v40 }
 0x38b   :  { %697 = vmatpush.msra.mxu0 %v670_v41 }
 0x38d   :  { %698 = vmatpush.msra.mxu0 %v669_v42 }
 0x38f   :  { %699 = vmatpush.msra.mxu0 %v668_v43 }
 0x391   :  { %700 = vmatpush.msra.mxu0 %v667_v44 }
 0x393   :  { %701 = vmatpush.msra.mxu0 %v666_v45 }
 0x3e7   :  { %v524_v14 = vpop.f32.mrf.mxu1 }
 0x3ed   :  { %v548_v12 = vpop.f32.mrf.mxu2 }
 0x3ee   :  { %v551_v13 = vadd.f32 %v730_v11, %v548_v12 }
 0x3f0   :  { %763 = vtanh.f32 %v551_v13 }
 0x3f1   :  { %v504_v15 = vpop.f32.mrf.mxu0 }
 0x3f2   :  { %v525_v16 = vadd.f32 %v524_v14, %v504_v15 }
 0x3f4   :  { %v527_v17 = vadd.f32 %v1276_v57, %v525_v16 }
 0x3f6   :  { %v764_v18 = vpop.eup %763  ;;  %765 = vtanh.f32 %v527_v17 }
 0x3f7   :  { %589 = vmatmul.f32.vlgmr.msrb.gmra.mxu0 %v764_v18  ;;  %613 = vmatmul.f32.vlgmr.msrb.gmra.mxu1 %v764_v18 }
 0x3fc   :  { %v766_v19 = vpop.eup %765 }
 0x3fd   :  { %569 = vmatmul.f32.vlgmr.msra.gmra.mxu3 %v766_v19 }
 0x474   :  { %v614_v24 = vpop.f32.mrf.mxu1  ;;  %v590_v27 = vpop.f32.mrf.mxu0 }
 0x475   :  { %v617_v25 = vadd.f32 %v731_v23, %v614_v24 }
 0x477   :  { %767 = vtanh.f32 %v617_v25 }
 0x47d   :  { %v768_v26 = vpop.eup %767 }
 0x47e   :  { %661 = vst [vmem:[#allocation2] sm:$0x3] %v768_v26  ;;  %655 = vmatmul.f32.vlgmr.msrb.gmra.mxu3 %v768_v26 }
 0x480   :  { %v570_v28 = vpop.f32.mrf.mxu3 }
 0x481   :  { %v591_v29 = vadd.f32 %v590_v27, %v570_v28 }
 0x483   :  { %v593_v30 = vadd.f32 %v1276_v57, %v591_v29 }
 0x485   :  { %769 = vtanh.f32 %v593_v30 }
 0x48b   :  { %v770_v31 = vpop.eup %769 }
 0x48c   :  { %635 = vmatmul.f32.vlgmr.msrb.gmra.mxu2 %v770_v31 }
 0x501   :  { %v656_v46 = vpop.f32.mrf.mxu3 }
 0x50f   :  { %v636_v47 = vpop.f32.mrf.mxu2 }
 0x510   :  { %v657_v48 = vadd.f32 %v656_v46, %v636_v47 }
 0x512   :  { %v659_v49 = vadd.f32 %v1276_v57, %v657_v48 }
 0x514   :  { %771 = vtanh.f32 %v659_v49 }
 0x51a   :  { %v772_v61 = vpop.eup %771 }
 0x51b   :  { %662 = vst [vmem:[#allocation3] sm:$0x3] %v772_v61  ;;  %702 = vmatmul.f32.vlgmr.msra.gmra.mxu0 %v772_v61 }
 0x598   :  { %v703_v63 = vpop.f32.mrf.mxu0 }
 0x599   :  { %v704_v0 = vadd.f32 %v740_v62, %v703_v63 }
 0x59b   :  { %706 = vst [vmem:[#allocation10] sm:$0x3] %v704_v0 }
 0x59c   :  { %717 = dma.vmem_to_hbm [thread:$0]  %s713_s3, 32, %s715_s17, [#allocation6]  }
 0x59d   :  { %873 = dma.done.wait [#allocation6], 32  }
 0x59e   :  { %874 = vsyncadd [#allocation6], 4294967264 }
 0x59f   :  { %722 = vsyncpa [#allocation5], 1 }
 0x5a0   :  { %723 = vsyncpa [#allocation8], 1 }
 0x5a1   :  { %724 = vsyncpa [#allocation6], 1 }

</bundles_post_ra>
